<compile_context>
chip_gen: v7x
topology: tpu7x:2x2x1
jax: 0.10.0
libtpu: 0.0.40
codegen_flags: <defaults>
</compile_context>

<pallas_src>
import math

import jax
import jax.numpy as jnp
from jax.experimental import pallas as pl
from jax.experimental.pallas import tpu as pltpu


def _round_up(x, m):
    return ((x + m - 1) // m) * m


# ----------------------------------------------------------------------------
# Pallas kernel:  out = n1 @ W_top + n2 @ W_bot + bias
# Grid = (E_pad/tm, Dout_pad/tn); K (=input_dim) is kept whole inside each
# tile, so there is no reduction axis and no accumulator scratch.
# ----------------------------------------------------------------------------
def _edge_linear_kernel(n1_ref, n2_ref, w1_ref, w2_ref, b_ref, o_ref):
    acc = jnp.dot(n1_ref[...], w1_ref[...], preferred_element_type=jnp.float32)
    acc = acc + jnp.dot(n2_ref[...], w2_ref[...], preferred_element_type=jnp.float32)
    o_ref[...] = (acc + b_ref[...]).astype(o_ref.dtype)


def _pick_tiles(E, K, Dout_pad):
    """Large-but-bounded tiles: <=512 rows/cols, ~2 MiB per streamed tile,
    so double-buffered inputs + output stay well under the scoped VMEM limit
    on every generation (incl. v7x's 64 MiB physical / 32 MiB default)."""
    bytes_per = 4  # f32
    rows_cap = max(8, ((2 << 20) // (K * bytes_per)) // 8 * 8)
    tm = min(512, rows_cap, _round_up(E, 8))

    cols_cap = min(512, max(128, ((2 << 20) // (K * bytes_per)) // 128 * 128))
    tn = 128
    for cand in (512, 384, 256, 128):
        if cand <= cols_cap and Dout_pad % cand == 0:
            tn = cand
            break
    return tm, tn


def edge_regression_matmul(n1, n2, w1, w2, bias, *, out_dtype=None):
    """out[E, Dout] = n1 @ w1 + n2 @ w2 + bias
    (split form of concat(n1, n2) @ [w1; w2] + bias)."""
    E, K = n1.shape
    assert n2.shape == (E, K)
    Kw, Dout = w1.shape
    assert Kw == K and w2.shape == (K, Dout) and bias.shape == (Dout,)
    out_dtype = n1.dtype if out_dtype is None else out_dtype

    Dout_pad = _round_up(Dout, 128)
    tm, tn = _pick_tiles(E, K, Dout_pad)
    E_pad = _round_up(E, tm)

    # Zero-pad ragged shapes; pads are sliced off the output below.
    if E_pad != E:
        pad = ((0, E_pad - E), (0, 0))
        n1 = jnp.pad(n1, pad)
        n2 = jnp.pad(n2, pad)
    if Dout_pad != Dout:
        wpad = ((0, 0), (0, Dout_pad - Dout))
        w1 = jnp.pad(w1, wpad)
        w2 = jnp.pad(w2, wpad)
        bias = jnp.pad(bias, ((0, Dout_pad - Dout),))
    b2d = bias.reshape(1, Dout_pad)

    grid = (E_pad // tm, Dout_pad // tn)
    f32 = 4
    cost = pl.CostEstimate(
        flops=2 * E_pad * (2 * K) * Dout_pad,
        transcendentals=0,
        bytes_accessed=(2 * E_pad * K            # n1, n2 streams
                        + 2 * K * Dout_pad       # W_top, W_bot
                        + Dout_pad               # bias
                        + E_pad * Dout_pad) * f32,  # output
    )

    out = pl.pallas_call(
        _edge_linear_kernel,
        out_shape=jax.ShapeDtypeStruct((E_pad, Dout_pad), out_dtype),
        grid_spec=pltpu.PrefetchScalarGridSpec(
            num_scalar_prefetch=0,
            grid=grid,
            in_specs=[
                pl.BlockSpec((tm, K), lambda i, j: (i, 0)),   # n1 rows (src)
                pl.BlockSpec((tm, K), lambda i, j: (i, 0)),   # n2 rows (dst)
                pl.BlockSpec((K, tn), lambda i, j: (0, j)),   # W_top columns
                pl.BlockSpec((K, tn), lambda i, j: (0, j)),   # W_bot columns
                pl.BlockSpec((1, tn), lambda i, j: (0, j)),   # bias
            ],
            out_specs=pl.BlockSpec((tm, tn), lambda i, j: (i, j)),
        ),
        compiler_params=pltpu.CompilerParams(
            dimension_semantics=("parallel", "parallel"),
            vmem_limit_bytes=32 * 1024 * 1024,
        ),
        cost_estimate=cost,
    )(n1, n2, w1, w2, b2d)

    return out[:E, :Dout]


# ----------------------------------------------------------------------------
# Module wrapper
# ----------------------------------------------------------------------------
class HeteGraphRecEdgeRegression:
    """JAX/Pallas port of the PyTorch HeteGraphRecEdgeRegression forward."""

    def __init__(self, input_dim, output_dim, *, combine_type="concat", key=None):
        self.input_dim = input_dim
        self.output_dim = output_dim
        self.combine_type = combine_type

        w_rows = input_dim * 2 if combine_type == "concat" else input_dim
        stdv = 1.0 / math.sqrt(output_dim)  # weight.size(1) == output_dim
        key = jax.random.PRNGKey(0) if key is None else key
        kw, kb = jax.random.split(key)
        # Deterministic uniform(-stdv, stdv) init, matching the PyTorch init.
        self.weight = jax.random.uniform(
            kw, (w_rows, output_dim), jnp.float32, minval=-stdv, maxval=stdv
        )
        self.bias = jax.random.uniform(
            kb, (output_dim,), jnp.float32, minval=-stdv, maxval=stdv
        )

    def forward(self, edge_idx, nodes_embeds):
        """
        edge_idx:     int32 [num_edges, 2] -- indices into the unique-node table
                      (the positional role of `unique_nodes.index(node)`).
        nodes_embeds: float32 [num_unique_nodes, input_dim] -- the aggregator
                      output for the unique nodes (external component;
                      supplied as a dense array here).
        Returns (edges_embedding [num_edges, output_dim], edges) where `edges`
        is the per-edge index pairs kept on device (convert to host tuples
        lazily / off the hot path).
        """
        if self.combine_type != "concat":
            # TODO(synk): non-'concat' combine_type leaves edges_embedding
            # unspecified (empty) in the original forward; not supported here.
            raise NotImplementedError("only combine_type='concat' is supported")

        # Glue: per-edge row gather of both endpoints (the Python loop in the
        # original).  The concat itself is NOT materialized -- the kernel
        # consumes the two row streams and the row-split weight directly.
        n1 = jnp.take(nodes_embeds, edge_idx[:, 0], axis=0)   # [E, D]
        n2 = jnp.take(nodes_embeds, edge_idx[:, 1], axis=0)   # [E, D]
        w_top = self.weight[: self.input_dim]                 # [D, Dout]
        w_bot = self.weight[self.input_dim:]                  # [D, Dout]

        edges_embedding = edge_regression_matmul(n1, n2, w_top, w_bot, self.bias)
        return edges_embedding, edge_idx


def edges_as_tuples(edge_idx):
    """Host-side tuple view of the edge list (call off the hot path)."""
    return [(int(a), int(b)) for a, b in jax.device_get(edge_idx)]


# ----------------------------------------------------------------------------
# Demo / self-check
# ----------------------------------------------------------------------------
if __name__ == "__main__":
    key = jax.random.PRNGKey(0)
    k_nodes, k_edges, k_params, k_nodes2, k_edges2 = jax.random.split(key, 5)

    # --- case 1: aligned small shapes --------------------------------------
    num_unique_nodes, num_edges = 10, 16
    input_dim, output_dim = 64, 128

    nodes_embeds = jax.random.normal(
        k_nodes, (num_unique_nodes, input_dim), jnp.float32
    )
    edge_idx = jax.random.randint(
        k_edges, (num_edges, 2), 0, num_unique_nodes, jnp.int32
    )

    model = HeteGraphRecEdgeRegression(
        input_dim, output_dim, combine_type="concat", key=k_params
    )
    out, ret_edges = model.forward(edge_idx, nodes_embeds)
    out = jax.block_until_ready(out)

    x_ref = jnp.concatenate(
        [nodes_embeds[edge_idx[:, 0]], nodes_embeds[edge_idx[:, 1]]], axis=-1
    )
    ref = jnp.dot(x_ref, model.weight,
                  precision=jax.lax.Precision.HIGHEST) + model.bias
    assert out.shape == (num_edges, output_dim)
    assert jnp.allclose(out, ref, atol=1e-4, rtol=1e-4), "mismatch (case 1)"

    # --- case 2: ragged shapes exercise the padding path --------------------
    E2, D2, Dout2, N2 = 13, 48, 96, 7
    nodes2 = jax.random.normal(k_nodes2, (N2, D2), jnp.float32)
    edges2 = jax.random.randint(k_edges2, (E2, 2), 0, N2, jnp.int32)
    model2 = HeteGraphRecEdgeRegression(D2, Dout2, combine_type="concat",
                                        key=k_params)
    out2, _ = model2.forward(edges2, nodes2)
    out2 = jax.block_until_ready(out2)

    xr2 = jnp.concatenate([nodes2[edges2[:, 0]], nodes2[edges2[:, 1]]], axis=-1)
    ref2 = jnp.dot(xr2, model2.weight,
                   precision=jax.lax.Precision.HIGHEST) + model2.bias
    assert out2.shape == (E2, Dout2)
    assert jnp.allclose(out2, ref2, atol=1e-4, rtol=1e-4), "mismatch (case 2)"

    # Host-side tuple form of the returned edges (off the hot path).
    unique_edges = edges_as_tuples(ret_edges)
    assert len(unique_edges) == num_edges

    print("KERNEL_OK")
</pallas_src>

<mosaic_0001>
module attributes {stable_mosaic.version = 11 : i64} {
  func.func @_edge_linear_kernel(%arg0: i32, %arg1: i32, %arg2: memref<16x64xf32, #tpu.memory_space<vmem>>, %arg3: memref<16x64xf32, #tpu.memory_space<vmem>>, %arg4: memref<64x128xf32, #tpu.memory_space<vmem>>, %arg5: memref<64x128xf32, #tpu.memory_space<vmem>>, %arg6: memref<1x128xf32, #tpu.memory_space<vmem>>, %arg7: memref<16x128xf32, #tpu.memory_space<vmem>>) attributes {dimension_semantics = [#tpu.dimension_semantics<parallel>, #tpu.dimension_semantics<parallel>], iteration_bounds = array<i64: 1, 1>, scalar_prefetch = 0 : i64, scratch_operands = 0 : i64, tpu.core_type = #tpu.core_type<tc>, window_params = [{transform_indices = @transform_0, window_bounds = array<i64: 16, 64>}, {transform_indices = @transform_1, window_bounds = array<i64: 16, 64>}, {transform_indices = @transform_2, window_bounds = array<i64: 64, 128>}, {transform_indices = @transform_3, window_bounds = array<i64: 64, 128>}, {transform_indices = @transform_4, window_bounds = array<i64: 1, 128>}, {transform_indices = @transform_5, window_bounds = array<i64: 16, 128>}]} {
    %c0 = arith.constant 0 : index
    %c0_0 = arith.constant 0 : index
    %0 = vector.load %arg2[%c0, %c0_0] : memref<16x64xf32, #tpu.memory_space<vmem>>, vector<16x64xf32>
    %c0_1 = arith.constant 0 : index
    %c0_2 = arith.constant 0 : index
    %1 = vector.load %arg4[%c0_1, %c0_2] : memref<64x128xf32, #tpu.memory_space<vmem>>, vector<64x128xf32>
    %cst = arith.constant dense<0.000000e+00> : vector<16x128xf32>
    %2 = tpu.matmul %0, %1, %cst {dimension_numbers = #tpu.dot_dimension_numbers<[1], [0], [0], [1], [0, 0, 1, 1], [], []>} : vector<16x64xf32>, vector<64x128xf32>, vector<16x128xf32> -> vector<16x128xf32>
    %c0_3 = arith.constant 0 : index
    %c0_4 = arith.constant 0 : index
    %3 = vector.load %arg3[%c0_3, %c0_4] : memref<16x64xf32, #tpu.memory_space<vmem>>, vector<16x64xf32>
    %c0_5 = arith.constant 0 : index
    %c0_6 = arith.constant 0 : index
    %4 = vector.load %arg5[%c0_5, %c0_6] : memref<64x128xf32, #tpu.memory_space<vmem>>, vector<64x128xf32>
    %cst_7 = arith.constant dense<0.000000e+00> : vector<16x128xf32>
    %5 = tpu.matmul %3, %4, %cst_7 {dimension_numbers = #tpu.dot_dimension_numbers<[1], [0], [0], [1], [0, 0, 1, 1], [], []>} : vector<16x64xf32>, vector<64x128xf32>, vector<16x128xf32> -> vector<16x128xf32>
    %6 = arith.addf %2, %5 : vector<16x128xf32>
    %c0_8 = arith.constant 0 : index
    %c0_9 = arith.constant 0 : index
    %7 = vector.load %arg6[%c0_8, %c0_9] : memref<1x128xf32, #tpu.memory_space<vmem>>, vector<1x128xf32>
    %8 = vector.broadcast %7 : vector<1x128xf32> to vector<16x128xf32>
    %9 = arith.addf %6, %8 : vector<16x128xf32>
    %c0_10 = arith.constant 0 : index
    %c0_11 = arith.constant 0 : index
    %10 = vector.load %arg7[%c0_10, %c0_11] : memref<16x128xf32, #tpu.memory_space<vmem>>, vector<16x128xf32>
    tpu.vector_store %arg7[%c0_10, %c0_11], %9 {strides = array<i32>} : memref<16x128xf32, #tpu.memory_space<vmem>>, vector<16x128xf32>,
    return
  }
  func.func @transform_0(%arg0: i32, %arg1: i32) -> (i32, i32) {
    %c0_i32 = arith.constant 0 : i32
    %c0_i32_0 = arith.constant 0 : i32
    return %arg0, %c0_i32 : i32, i32
  }
  func.func @transform_1(%arg0: i32, %arg1: i32) -> (i32, i32) {
    %c0_i32 = arith.constant 0 : i32
    %c0_i32_0 = arith.constant 0 : i32
    return %arg0, %c0_i32 : i32, i32
  }
  func.func @transform_2(%arg0: i32, %arg1: i32) -> (i32, i32) {
    %c0_i32 = arith.constant 0 : i32
    %c0_i32_0 = arith.constant 0 : i32
    return %c0_i32, %arg1 : i32, i32
  }
  func.func @transform_3(%arg0: i32, %arg1: i32) -> (i32, i32) {
    %c0_i32 = arith.constant 0 : i32
    %c0_i32_0 = arith.constant 0 : i32
    return %c0_i32, %arg1 : i32, i32
  }
  func.func @transform_4(%arg0: i32, %arg1: i32) -> (i32, i32) {
    %c0_i32 = arith.constant 0 : i32
    %c0_i32_0 = arith.constant 0 : i32
    return %c0_i32, %arg1 : i32, i32
  }
  func.func @transform_5(%arg0: i32, %arg1: i32) -> (i32, i32) {
    %c0_i32 = arith.constant 0 : i32
    return %arg0, %arg1 : i32, i32
  }
}

</mosaic_0001>

<bundles_post_ra>
// kernel: tpu_custom_call.1
= control target key start
LH: loop header
LB: loop body
LE: loop exit
PB: predicated region body
PF: predicated region fallthrough
CT: control target
= control target key end

     0   :  { %10 = vsyncpa [#allocation3], 0  ;;  %s644_s0 = inlined_call_operand.hbm [shape: f32[16,64], index: 0, kind: input, shape index: {}]   ;;  %s645_s1 = inlined_call_operand.hbm [shape: f32[16,64], index: 1, kind: input, shape index: {}]   ;;  %s646_s2 = inlined_call_operand.hbm [shape: f32[64,128], index: 2, kind: input, shape index: {}]   ;;  %s647_s3 = inlined_call_operand.hbm [shape: f32[64,128], index: 3, kind: input, shape index: {}]   ;;  %s648_s4 = inlined_call_operand.vmem [shape: f32[1,128], index: 4, kind: input, shape index: {}]   ;;  %s649_s5 = inlined_call_operand.hbm [shape: f32[16,128], index: 5, kind: output, shape index: {}]  }
   0x1   :  { %11 = vsyncpa [#allocation6], 0 }
   0x2   :  { %12 = vsyncpa [#allocation9], 0 }
   0x3   :  { %13 = vsyncpa [#allocation4], 0  ;;  %s511_s18 = smov [#allocation5]   ;;  %s512_s20 = smov [#allocation2]  }
   0x4   :  { %s31_s19 = sshll.u32 %s511_s18, 4  ;;  %s19_s21 = sshll.u32 %s512_s20, 4  ;;  %s32_s19 = int_to_ptr.vmem [resolvable:$true] %s31_s19  ;;  %s548_s21 = int_to_ptr.vmem [resolvable:$true] %s19_s21 }
   0x5   :  { %s393_s24 = scalar_lea.hbm %s645_s1, 256 }
   0x6   :  { %p394_p0 = scmp.ne.s32.totalorder %s645_s1, %s393_s24  ;;  %p397_p1 = scmp.lt.u32.totalorder %s393_s24, %s645_s1 }
   0x8   :  { %p399_p2 = pnand %p397_p1, %p394_p0 }
   0xa   :  { %402 = shalt.err (!%p399_p2)
}
   0xb   :  { %s403_s29 = scalar_lea.vmem %s32_s19, 256  ;;  %p408_p4 = scmp.lt.s32.totalorder %s32_s19, %s32_s19 }
   0xc   :  { %p404_p3 = scmp.ne.s32.totalorder %s32_s19, %s403_s29  ;;  %p409_p5 = scmp.lt.s32.totalorder %s403_s29, %s403_s29 }
   0xe   :  { %p410_p6 = por %p409_p5, %p408_p4 }
  0x10   :  { %p411_p7 = pnand %p410_p6, %p404_p3 }
  0x12   :  { %414 = shalt.err (!%p411_p7)
}
  0x13   :  { %s513_s30 = smov 128   ;;  %s514_s6 = smov 8  }
  0x14   :  { %37 = dma.hbm_to_vmem [thread:$0]  %s645_s1, 256, %s32_s19, [#allocation6], %s513_s30, %s513_s30, %s514_s6  }
  0x15   :  { %s415_s11 = scalar_lea.hbm %s644_s0, 256 }
  0x16   :  { %p416_p8 = scmp.ne.s32.totalorder %s644_s0, %s415_s11  ;;  %p419_p9 = scmp.lt.u32.totalorder %s415_s11, %s644_s0 }
  0x18   :  { %p421_p10 = pnand %p419_p9, %p416_p8 }
  0x1a   :  { %424 = shalt.err (!%p421_p10)
}
  0x1b   :  { %s425_s16 = scalar_lea.vmem %s548_s21, 256  ;;  %p430_p12 = scmp.lt.s32.totalorder %s548_s21, %s548_s21 }
  0x1c   :  { %p426_p11 = scmp.ne.s32.totalorder %s548_s21, %s425_s16  ;;  %p431_p13 = scmp.lt.s32.totalorder %s425_s16, %s425_s16 }
  0x1e   :  { %p432_p0 = por %p431_p13, %p430_p12 }
  0x20   :  { %p433_p1 = pnand %p432_p0, %p426_p11 }
  0x22   :  { %436 = shalt.err (!%p433_p1)
}
  0x23   :  { %25 = dma.hbm_to_vmem [thread:$0]  %s644_s0, 256, %s548_s21, [#allocation3], %s513_s30, %s513_s30, %s514_s6  }
  0x24   :  { %s515_s18 = smov [#allocation7]   ;;  %s516_s20 = smov [#allocation8]  }
  0x25   :  { %s43_s19 = sshll.u32 %s515_s18, 4  ;;  %s55_s22 = sshll.u32 %s516_s20, 4  ;;  %s44_s19 = int_to_ptr.vmem [resolvable:$true] %s43_s19  ;;  %s585_s22 = int_to_ptr.vmem [resolvable:$true] %s55_s22 }
  0x26   :  { %s437_s25 = scalar_lea.hbm %s646_s2, 1024 }
  0x27   :  { %p438_p2 = scmp.ne.s32.totalorder %s646_s2, %s437_s25  ;;  %p441_p3 = scmp.lt.u32.totalorder %s437_s25, %s646_s2 }
  0x29   :  { %p443_p4 = pnand %p441_p3, %p438_p2 }
  0x2b   :  { %446 = shalt.err (!%p443_p4)
}
  0x2c   :  { %s447_s0 = scalar_lea.vmem %s44_s19, 1024  ;;  %p452_p6 = scmp.lt.s32.totalorder %s44_s19, %s44_s19 }
  0x2d   :  { %p448_p5 = scmp.ne.s32.totalorder %s44_s19, %s447_s0  ;;  %p453_p7 = scmp.lt.s32.totalorder %s447_s0, %s447_s0 }
  0x2f   :  { %p454_p8 = por %p453_p7, %p452_p6 }
  0x31   :  { %p455_p9 = pnand %p454_p8, %p448_p5 }
  0x33   :  { %458 = shalt.err (!%p455_p9)
}
  0x34   :  { %49 = dma.hbm_to_vmem [thread:$0]  %s646_s2, 1024, %s44_s19, [#allocation6], %s513_s30, %s513_s30, %s514_s6  }
  0x35   :  { %s459_s10 = scalar_lea.hbm %s647_s3, 1024 }
  0x36   :  { %p460_p10 = scmp.ne.s32.totalorder %s647_s3, %s459_s10  ;;  %p463_p11 = scmp.lt.u32.totalorder %s459_s10, %s647_s3 }
  0x38   :  { %p465_p12 = pnand %p463_p11, %p460_p10 }
  0x3a   :  { %468 = shalt.err (!%p465_p12)
}
  0x3b   :  { %s469_s15 = scalar_lea.vmem %s585_s22, 1024  ;;  %p474_p0 = scmp.lt.s32.totalorder %s585_s22, %s585_s22 }
  0x3c   :  { %p470_p13 = scmp.ne.s32.totalorder %s585_s22, %s469_s15  ;;  %p475_p1 = scmp.lt.s32.totalorder %s469_s15, %s469_s15 }
  0x3e   :  { %p476_p2 = por %p475_p1, %p474_p0 }
  0x40   :  { %p477_p3 = pnand %p476_p2, %p470_p13 }
  0x42   :  { %480 = shalt.err (!%p477_p3)
}
  0x43   :  { %61 = dma.hbm_to_vmem [thread:$0]  %s647_s3, 1024, %s585_s22, [#allocation9], %s513_s30, %s513_s30, %s514_s6  }
  0x44   :  { %503 = dma.done.wait [#allocation3], 256  }
  0x45   :  { %504 = vsyncadd [#allocation3], 4294967040 }
  0x46   :  { %505 = dma.done.wait [#allocation6], 1280  }
  0x47   :  { %506 = vsyncadd [#allocation6], 4294966016 }
  0x48   :  { %507 = dma.done.wait [#allocation9], 1024  }
  0x49   :  { %508 = vsyncadd [#allocation9], 4294966272  ;;  %v88_v0 = vld [vmem:[#allocation8] sm:$0xff]  ;;  %v89_v1 = vld [vmem:[#allocation8 + $0x8] sm:$0xff]  ;;  %vm96_vm0 = vcmask 523264   ;;  %s517_s17 = smov [#allocation10]  }
  0x4a   :  { %v78_v2 = vld [vmem:[#allocation7] sm:$0xff]  ;;  %v352_v3 = vpack.c.bf16 %v89_v1, %v88_v0  ;;  %v79_v4 = vld [vmem:[#allocation7 + $0x8] sm:$0xff]  ;;  %v90_v5 = vld [vmem:[#allocation8 + $0x10] sm:$0xff]  ;;  %s275_s18 = sshll.u32 %s517_s17, 4  ;;  %s276_s18 = int_to_ptr.vmem [resolvable:$true] %s275_s18 }
  0x4b   :  { %v91_v6 = vld [vmem:[#allocation8 + $0x18] sm:$0xff]  ;;  %v368_v7 = vpack.c.bf16 %v79_v4, %v78_v2  ;;  %v80_v9 = vld [vmem:[#allocation7 + $0x10] sm:$0xff]  ;;  %v92_v11 = vld [vmem:[#allocation8 + $0x20] sm:$0xff]  ;;  %s481_s19 = scalar_lea.vmem %s276_s18, 256  ;;  %p486_p5 = scmp.lt.s32.totalorder %s276_s18, %s276_s18 }
  0x4c   :  { %v356_v8 = vpack.c.bf16 %v91_v6, %v90_v5  ;;  %v81_v10 = vld [vmem:[#allocation7 + $0x18] sm:$0xff]  ;;  %353 = vmatprep.subr.bf16.mxu1 %v352_v3  ;;  %v93_v13 = vld [vmem:[#allocation8 + $0x28] sm:$0xff]  ;;  %v82_v14 = vld [vmem:[#allocation7 + $0x20] sm:$0xff]  ;;  %p482_p4 = scmp.ne.s32.totalorder %s276_s18, %s481_s19  ;;  %p487_p6 = scmp.lt.s32.totalorder %s481_s19, %s481_s19 }
  0x4d   :  { %v372_v12 = vpack.c.bf16 %v81_v10, %v80_v9  ;;  %v83_v15 = vld [vmem:[#allocation7 + $0x28] sm:$0xff]  ;;  %369 = vmatprep.subr.bf16.mxu0 %v368_v7  ;;  %355 = vmatpush3.bf16.msra.mxu1 %v352_v3  ;;  %v360_v16 = vpack.c.bf16 %v93_v13, %v92_v11  ;;  %v86_v17 = vld [vmem:[#allocation5] sm:$0xff]  ;;  %v76_v18 = vld [vmem:[#allocation2] sm:$0xff] }
  0x4e   :  { %371 = vmatpush3.bf16.msra.mxu0 %v368_v7  ;;  %357 = vmatprep.subr.bf16.mxu1 %v356_v8  ;;  %v376_v19 = vpack.c.bf16 %v83_v15, %v82_v14  ;;  %v94_v20 = vld [vmem:[#allocation8 + $0x30] sm:$0xff]  ;;  %v95_v21 = vld [vmem:[#allocation8 + $0x38] sm:$0xff]  ;;  %v77_v27 = vld [vmem:[#allocation2 + $0x8] sm:$0xff]  ;;  %p488_p7 = por %p487_p6, %p486_p5 }
  0x4f   :  { %373 = vmatprep.subr.bf16.mxu0 %v372_v12  ;;  %330 = vmatprep.mubr.msk.f32.mxu1 %vm96_vm0, %v86_v17  ;;  %v84_v22 = vld [vmem:[#allocation7 + $0x30] sm:$0xff]  ;;  %v85_v23 = vld [vmem:[#allocation7 + $0x38] sm:$0xff]  ;;  %v364_v24 = vpack.c.bf16 %v95_v21, %v94_v20  ;;  %v293_v30 = vld [vmem:[%s648_s4] ss:$0 sm:$0xff] }
  0x50   :  { %349 = vmatprep.mubr.msk.f32.mxu0 %vm96_vm0, %v76_v18  ;;  %v380_v25 = vpack.c.bf16 %v85_v23, %v84_v22  ;;  %v87_v26 = vld [vmem:[#allocation5 + $0x8] sm:$0xff]  ;;  %p489_p8 = pnand %p488_p7, %p482_p4 }
  0x51   :  { %359 = vmatpush3.bf16.msra.mxu1 %v356_v8 }
  0x52   :  { %375 = vmatpush3.bf16.msra.mxu0 %v372_v12  ;;  %361 = vmatprep.subr.bf16.mxu1 %v360_v16 }
  0x53   :  { %377 = vmatprep.subr.bf16.mxu0 %v376_v19 }
  0x55   :  { %363 = vmatpush3.bf16.msra.mxu1 %v360_v16 }
  0x56   :  { %379 = vmatpush3.bf16.msra.mxu0 %v376_v19  ;;  %365 = vmatprep.subr.bf16.mxu1 %v364_v24 }
  0x57   :  { %381 = vmatprep.subr.bf16.mxu0 %v380_v25 }
  0x59   :  { %367 = vmatpush3.bf16.msra.mxu1 %v364_v24 }
  0x5a   :  { %383 = vmatpush3.bf16.msra.mxu0 %v380_v25 }
  0x5c   :  { %331 = vmatmul.mubr.msk.f32.vlgmr.msra.gmra.mrb[0].mxu1 %vm96_vm0, %v87_v26 }
  0x5d   :  { %350 = vmatmul.mubr.msk.f32.vlgmr.msra.gmra.mrb[0].mxu0 %vm96_vm0, %v77_v27 }
 0x12f   :  { %v332_v28 = vpop.f32.mrb[0].mxu1 }
 0x130   :  { %v351_v29 = vpop.f32.mrb[0].mxu0  ;;  %v169_v31 = vpop.f32.mrb[1].mxu1 }
 0x131   :  { %v256_v32 = vadd.f32 %v351_v29, %v332_v28  ;;  %v250_v33 = vpop.f32.mrb[1].mxu0 }
 0x132   :  { %v251_v34 = vadd.f32 %v250_v33, %v169_v31 }
 0x133   :  { %v267_v35 = vadd.f32 %v293_v30, %v256_v32 }
 0x134   :  { %v266_v36 = vadd.f32 %v293_v30, %v251_v34 }
 0x135   :  { %269 = vst [vmem:[#allocation10 + $0x8] sm:$0xff] %v267_v35 }
 0x136   :  { %268 = vst [vmem:[#allocation10] sm:$0xff] %v266_v36 }
 0x137   :  { %492 = shalt.err (!%p489_p8)
}
 0x138   :  { %s493_s22 = scalar_lea.hbm %s649_s5, 256 }
 0x139   :  { %p494_p9 = scmp.ne.s32.totalorder %s649_s5, %s493_s22  ;;  %p497_p10 = scmp.lt.u32.totalorder %s493_s22, %s649_s5 }
 0x13b   :  { %p499_p11 = pnand %p497_p10, %p494_p9 }
 0x13d   :  { %502 = shalt.err (!%p499_p11)
}
 0x13e   :  { %281 = dma.vmem_to_hbm [thread:$0]  %s276_s18, 256, %s649_s5, [#allocation4], %s513_s30, %s513_s30, %s514_s6  }
 0x13f   :  { %509 = dma.done.wait [#allocation4], 256  }
 0x140   :  { %510 = vsyncadd [#allocation4], 4294967040 }
 0x141   :  { %285 = vsyncpa [#allocation3], 1 }
 0x142   :  { %286 = vsyncpa [#allocation6], 1 }
 0x143   :  { %287 = vsyncpa [#allocation9], 1 }
 0x144   :  { %288 = vsyncpa [#allocation4], 1 }

</bundles_post_ra>
